<compile_context>
chip_gen: v7x
topology: tpu7x:2x2x1
jax: 0.10.0
libtpu: 0.0.40
codegen_flags: <defaults>
</compile_context>

<pallas_src>
import jax
import jax.numpy as jnp
import numpy as np
from jax.experimental import pallas as pl
from jax.experimental.pallas import tpu as pltpu

K = 7    # conv kernel size
PAD = 3  # same-size padding


def tsa_kernel(x_ref, a_ref, o_ref):
    """One block of Bblk batch elements, spatially flattened.

    x_ref : VMEM (Bblk, C, HW) f32   lane-dense input slab (lane dim = H*W)
    a_ref : VMEM (2*HW, HW)    bf16  stacked conv-as-matmul operator
                                     (rows [0,HW) = avg path, [HW,2HW) = max
                                     path); whole-array resident, single copy
    o_ref : VMEM (Bblk, C, HW) f32
    """
    x = x_ref[...]                                     # (Bblk, C, HW) f32

    # Channel statistics per batch element; kept in f32 (v5e has no bf16 VPU).
    x_avg = jnp.mean(x, axis=1)                        # (Bblk, HW)
    x_max = jnp.max(x, axis=1)                         # (Bblk, HW)
    act = jnp.concatenate([x_avg, x_max], axis=-1)     # (Bblk, 2*HW)

    # Fused 7x7 conv over the 2-channel [avg, max] map == one MXU matmul
    # against the stacked operator: bf16 operands, f32 accumulation.
    xs = jnp.dot(act.astype(a_ref.dtype), a_ref[...],
                 preferred_element_type=jnp.float32)   # (Bblk, HW) f32

    gate = jax.nn.sigmoid(xs)                          # f32, EUP
    o_ref[...] = x * gate[:, None, :]                  # broadcast over C


def build_conv_operator(conv_w, H, W, dtype=jnp.bfloat16):
    """Fold nn.Conv2d(2, 1, 7, stride=1, pad=3, bias=False) into one stacked
    (2*H*W, H*W) matrix A such that, for flattened (1, H*W) maps,

        conv(cat([m_avg, m_max]))  ==  concat([m_avg, m_max], -1) @ A

    A[c*HW + yi*W + xi, yo*W + xo] = w[0, c, yi - yo + 3, xi - xo + 3]
    (zero outside the 7x7 support) — exactly nn.Conv2d's zero-padded
    cross-correlation.  Build this ONCE per weight (frozen weights -> cache it
    outside the jitted forward) and store it in bf16.
    """
    wk = jnp.asarray(conv_w)[0].astype(jnp.float32)                 # (2, 7, 7)
    dy = jnp.arange(H)[:, None] - jnp.arange(H)[None, :] + PAD      # (H, H) [yi,yo]
    dx = jnp.arange(W)[:, None] - jnp.arange(W)[None, :] + PAD      # (W, W) [xi,xo]
    valid = (((dy >= 0) & (dy < K))[None, :, :, None, None]
             & ((dx >= 0) & (dx < K))[None, None, None, :, :])
    a = wk[:, jnp.clip(dy, 0, K - 1)][:, :, :, jnp.clip(dx, 0, K - 1)]
    # a[c, yi, yo, xi, xo] = w[c, yi - yo + 3, xi - xo + 3]
    a = jnp.where(valid, a, 0.0)
    a = a.transpose(0, 1, 3, 2, 4)                     # (c, yi, xi, yo, xo)
    return a.reshape(2 * H * W, H * W).astype(dtype)


def _choose_batch_block(B):
    """Batches per grid step.  Tiny B: one step (per-step overhead dominates).
    Larger B: a divisor of B in [8, 32] that leaves grid length >= 2 so the
    'parallel' batch axis can shard across v7x's two TensorCores."""
    if B <= 8:
        return B
    for bb in range(min(32, B // 2), 7, -1):
        if B % bb == 0:
            return bb
    for bb in range(min(32, B // 2), 0, -1):
        if B % bb == 0:
            return bb
    return 1


def tsa_pallas(x, a_op):
    """x: (B, C, H, W) float, a_op: (2*H*W, H*W) stacked conv operator."""
    B, C, H, W = x.shape
    HW = H * W
    assert a_op.shape == (2 * HW, HW), a_op.shape

    bblk = _choose_batch_block(B)
    grid = (B // bblk,)

    x_flat = x.reshape(B, C, HW).astype(jnp.float32)   # free reshape in HBM

    # Generation-aware VMEM budget (v7x: 64 MiB/core; v5e/v6e: 128 MiB).
    try:
        vmem_cap = int(pltpu.get_tpu_info().vmem_capacity_bytes)
    except Exception:
        vmem_cap = 64 << 20                            # conservative default
    vmem_budget = min(int(0.60 * vmem_cap), 64 << 20)  # ~38 MiB v7x, 64 MiB v5e/v6e

    blk_bytes = bblk * C * HW * 4                      # one (Bblk, C, HW) f32 block
    op_bytes = int(a_op.size) * a_op.dtype.itemsize    # resident, single-buffered
    need = 2 * 2 * blk_bytes + op_bytes + (2 << 20)    # dbl-buffered in+out, operator, slack
    if need > vmem_budget:
        # TODO(synk): banded (W, W) Toeplitz matmuls with an H-tile + halo grid
        # for large feature maps; the dense operator path assumes VMEM residency.
        raise NotImplementedError(
            f"dense conv-operator path needs ~{need >> 20} MiB VMEM, "
            f"budget is {vmem_budget >> 20} MiB on this chip generation")
    vmem_limit = int(min(max(need, 16 << 20), vmem_budget))

    out_flat = pl.pallas_call(
        tsa_kernel,
        out_shape=jax.ShapeDtypeStruct((B, C, HW), jnp.float32),
        grid=grid,
        in_specs=[
            # Per-step slab of Bblk batch elements, lane-dense on H*W.
            pl.BlockSpec((bblk, C, HW), lambda b: (b, 0, 0)),
            # Whole conv operator resident in VMEM: copied once before the
            # grid, single copy (no double buffering), never re-fetched.
            pl.BlockSpec(memory_space=pltpu.MemorySpace.VMEM),
        ],
        out_specs=pl.BlockSpec((bblk, C, HW), lambda b: (b, 0, 0)),
        compiler_params=pltpu.CompilerParams(
            dimension_semantics=("parallel",),
            vmem_limit_bytes=vmem_limit,
        ),
    )(x_flat, a_op)

    return out_flat.reshape(B, C, H, W).astype(x.dtype)


def tsa_reference(x, conv_w):
    """Plain-JAX reference mirroring the PyTorch forward (f32, HIGHEST)."""
    x_avg = jnp.mean(x, axis=1, keepdims=True)
    x_max = jnp.max(x, axis=1, keepdims=True)
    xt = jnp.concatenate([x_avg, x_max], axis=1)
    xs = jax.lax.conv_general_dilated(
        xt, conv_w, window_strides=(1, 1), padding=[(PAD, PAD), (PAD, PAD)],
        dimension_numbers=("NCHW", "OIHW", "NCHW"),
        precision=jax.lax.Precision.HIGHEST)
    return x * jax.nn.sigmoid(xs)


if __name__ == "__main__":
    B, C, H, W = 2, 4, 16, 16

    key = jax.random.PRNGKey(0)
    kx, kw = jax.random.split(key)
    x = jax.random.normal(kx, (B, C, H, W), dtype=jnp.float32)

    # Deterministic param init (kaiming-uniform-ish bound for a 2x7x7 fan-in).
    fan_in = 2 * K * K
    bound = float(np.sqrt(1.0 / fan_in))
    conv_w = jax.random.uniform(kw, (1, 2, K, K), jnp.float32, -bound, bound)
    # NOTE: self.conv1's (1x1) result is discarded and self.conv2 is never
    # called in the PyTorch forward, so neither affects the output; omitted.

    # Build the folded conv operator ONCE, outside the jitted forward
    # (frozen weights -> cacheable); bf16 halves its DMA/VMEM footprint.
    a_op = jax.block_until_ready(build_conv_operator(conv_w, H, W,
                                                     dtype=jnp.bfloat16))

    out = jax.jit(tsa_pallas)(x, a_op)
    out = jax.block_until_ready(out)

    ref = tsa_reference(x, conv_w)
    # bf16 matmul operands (f32 accumulation) -> loosened tolerance vs the
    # f32 HIGHEST reference, as recommended by the review.
    np.testing.assert_allclose(np.asarray(out), np.asarray(ref),
                               rtol=5e-3, atol=5e-3)

    print("KERNEL_OK")
</pallas_src>

<mosaic_0001>
module attributes {stable_mosaic.version = 11 : i64} {
  func.func @tsa_kernel(%arg0: i32, %arg1: memref<2x4x256xf32, #tpu.memory_space<vmem>>, %arg2: memref<512x256xbf16, #tpu.memory_space<vmem>>, %arg3: memref<2x4x256xf32, #tpu.memory_space<vmem>>) attributes {dimension_semantics = [#tpu.dimension_semantics<parallel>], iteration_bounds = array<i64: 1>, scalar_prefetch = 0 : i64, scratch_operands = 0 : i64, tpu.core_type = #tpu.core_type<tc>, window_params = [{transform_indices = @transform_0, window_bounds = array<i64: 2, 4, 256>}, {pipeline_mode = #tpu.pipeline_mode<synchronous>, transform_indices = @transform_1, window_bounds = array<i64: 512, 256>}, {transform_indices = @transform_2, window_bounds = array<i64: 2, 4, 256>}]} {
    %c0 = arith.constant 0 : index
    %c0_0 = arith.constant 0 : index
    %c0_1 = arith.constant 0 : index
    %0 = vector.load %arg1[%c0, %c0_0, %c0_1] : memref<2x4x256xf32, #tpu.memory_space<vmem>>, vector<2x4x256xf32>
    %cst = arith.constant dense<0.000000e+00> : vector<2x256xf32>
    %1 = vector.multi_reduction <add>, %0, %cst [1] : vector<2x4x256xf32> to vector<2x256xf32>
    %cst_2 = arith.constant 4.000000e+00 : f32
    %2 = vector.broadcast %cst_2 : f32 to vector<2x256xf32>
    %3 = arith.divf %1, %2 : vector<2x256xf32>
    %cst_3 = arith.constant dense<0xFF800000> : vector<2x256xf32>
    %4 = vector.multi_reduction <maximumf>, %0, %cst_3 [1] : vector<2x4x256xf32> to vector<2x256xf32>
    %5 = tpu.concatenate %3, %4 in 1 : vector<2x256xf32>, vector<2x256xf32> -> vector<2x512xf32>
    %6 = arith.truncf %5 : vector<2x512xf32> to vector<2x512xbf16>
    %c0_4 = arith.constant 0 : index
    %c0_5 = arith.constant 0 : index
    %7 = vector.load %arg2[%c0_4, %c0_5] : memref<512x256xbf16, #tpu.memory_space<vmem>>, vector<512x256xbf16>
    %cst_6 = arith.constant dense<0.000000e+00> : vector<2x256xf32>
    %8 = tpu.matmul %6, %7, %cst_6 {dimension_numbers = #tpu.dot_dimension_numbers<[1], [0], [0], [1], [0, 0, 1, 1], [], []>} : vector<2x512xbf16>, vector<512x256xbf16>, vector<2x256xf32> -> vector<2x256xf32>
    %9 = arith.negf %8 : vector<2x256xf32>
    %10 = math.exp %9 : vector<2x256xf32>
    %cst_7 = arith.constant 1.000000e+00 : f32
    %11 = vector.broadcast %cst_7 : f32 to vector<2x256xf32>
    %12 = arith.addf %11, %10 : vector<2x256xf32>
    %13 = arith.divf %11, %12 : vector<2x256xf32>
    %14 = vector.shape_cast %13 : vector<2x256xf32> to vector<2x1x256xf32>
    %15 = vector.broadcast %14 : vector<2x1x256xf32> to vector<2x4x256xf32>
    %16 = arith.mulf %0, %15 : vector<2x4x256xf32>
    %c0_8 = arith.constant 0 : index
    %c0_9 = arith.constant 0 : index
    %c0_10 = arith.constant 0 : index
    %17 = vector.load %arg3[%c0_8, %c0_9, %c0_10] : memref<2x4x256xf32, #tpu.memory_space<vmem>>, vector<2x4x256xf32>
    tpu.vector_store %arg3[%c0_8, %c0_9, %c0_10], %16 {strides = array<i32>} : memref<2x4x256xf32, #tpu.memory_space<vmem>>, vector<2x4x256xf32>,
    return
  }
  func.func @transform_0(%arg0: i32) -> (i32, i32, i32) {
    %c0_i32 = arith.constant 0 : i32
    %c0_i32_0 = arith.constant 0 : i32
    %c0_i32_1 = arith.constant 0 : i32
    return %arg0, %c0_i32, %c0_i32_0 : i32, i32, i32
  }
  func.func @transform_1(%arg0: i32) -> (i32, i32) {
    %c0_i32 = arith.constant 0 : i32
    %c0_i32_0 = arith.constant 0 : i32
    %c0_i32_1 = arith.constant 0 : i32
    return %c0_i32, %c0_i32_0 : i32, i32
  }
  func.func @transform_2(%arg0: i32) -> (i32, i32, i32) {
    %c0_i32 = arith.constant 0 : i32
    %c0_i32_0 = arith.constant 0 : i32
    %c0_i32_1 = arith.constant 0 : i32
    return %arg0, %c0_i32, %c0_i32_0 : i32, i32, i32
  }
}

</mosaic_0001>

<bundles_post_ra>
// kernel: tsa_pallas.1
= control target key start
LH: loop header
LB: loop body
LE: loop exit
PB: predicated region body
PF: predicated region fallthrough
CT: control target
= control target key end

     0   :  { %7 = vsyncpa [#allocation3], 0  ;;  %s850_s9 = smov [#allocation2]   ;;  %s919_s0 = inlined_call_operand.vmem [shape: f32[2,4,256], index: 0, kind: input, shape index: {}]   ;;  %s920_s1 = inlined_call_operand.hbm [shape: bf16[512,256], index: 1, kind: input, shape index: {}]   ;;  %s921_s2 = inlined_call_operand.vmem [shape: f32[2,4,256], index: 2, kind: output, shape index: {}]  }
   0x1   :  { %s15_s10 = sshll.u32 %s850_s9, 4  ;;  %s826_s13 = scalar_lea.hbm %s920_s1, 8192  ;;  %s16_s10 = int_to_ptr.vmem [resolvable:$true] %s15_s10 }
   0x2   :  { %p827_p0 = scmp.ne.s32.totalorder %s920_s1, %s826_s13  ;;  %p830_p1 = scmp.lt.u32.totalorder %s826_s13, %s920_s1 }
   0x4   :  { %p832_p2 = pnand %p830_p1, %p827_p0 }
   0x6   :  { %835 = shalt.err (!%p832_p2)
}
   0x7   :  { %s836_s18 = scalar_lea.vmem %s16_s10, 8192  ;;  %p841_p4 = scmp.lt.s32.totalorder %s16_s10, %s16_s10 }
   0x8   :  { %p837_p3 = scmp.ne.s32.totalorder %s16_s10, %s836_s18  ;;  %p842_p5 = scmp.lt.s32.totalorder %s836_s18, %s836_s18 }
   0xa   :  { %p843_p6 = por %p842_p5, %p841_p4 }
   0xc   :  { %p844_p7 = pnand %p843_p6, %p837_p3 }
   0xe   :  { %847 = shalt.err (!%p844_p7)
}
   0xf   :  { %s851_s19 = smov 128   ;;  %s852_s20 = smov 8  }
  0x10   :  { %21 = dma.hbm_to_vmem [thread:$0]  %s920_s1, 8192, %s16_s10, [#allocation3], %s851_s19, %s851_s19, %s852_s20  }
  0x11   :  { %848 = dma.done.wait [#allocation3], 8192  }
  0x12   :  { %849 = vsyncadd [#allocation3], 4294959104  ;;  %v720_v0 = vld [vmem:[#allocation2 + $0x4] ss:$8 sps:$4 sm:$0xff]   ;;  %v724_v2 = vld [vmem:[#allocation2] ss:$8 sps:$4 sm:$0xff]  }
  0x13   :  { %v722_v1 = vld [vmem:[#allocation2 + $0x104] ss:$8 sps:$4 sm:$0xff]   ;;  %500 = vmatprep.subr.bf16.mxu1 %v720_v0  ;;  %v725_v3 = vld [vmem:[#allocation2 + $0x100] ss:$8 sps:$4 sm:$0xff]   ;;  %v726_v4 = vld [vmem:[#allocation2 + $0x14] ss:$8 sps:$4 sm:$0xff]  }
  0x14   :  { %541 = vmatprep.subr.bf16.mxu0 %v722_v1  ;;  %501 = vmatpush1.bf16.msra.mxu1 %v724_v2  ;;  %v728_v5 = vld [vmem:[#allocation2 + $0x114] ss:$8 sps:$4 sm:$0xff]   ;;  %v730_v6 = vld [vmem:[#allocation2 + $0x10] ss:$8 sps:$4 sm:$0xff]   ;;  %v732_v8 = vld [vmem:[#allocation2 + $0x24] ss:$8 sps:$4 sm:$0xff]  }
  0x15   :  { %542 = vmatpush1.bf16.msra.mxu0 %v725_v3  ;;  %502 = vmatprep.subr.bf16.mxu1 %v726_v4  ;;  %v731_v7 = vld [vmem:[#allocation2 + $0x110] ss:$8 sps:$4 sm:$0xff]   ;;  %v734_v9 = vld [vmem:[#allocation2 + $0x124] ss:$8 sps:$4 sm:$0xff]   ;;  %v736_v10 = vld [vmem:[#allocation2 + $0x20] ss:$8 sps:$4 sm:$0xff]  }
  0x16   :  { %543 = vmatprep.subr.bf16.mxu0 %v728_v5  ;;  %v737_v11 = vld [vmem:[#allocation2 + $0x120] ss:$8 sps:$4 sm:$0xff]   ;;  %v738_v12 = vld [vmem:[#allocation2 + $0x34] ss:$8 sps:$4 sm:$0xff]   ;;  %v742_v14 = vld [vmem:[#allocation2 + $0x30] ss:$8 sps:$4 sm:$0xff]  }
  0x17   :  { %v740_v13 = vld [vmem:[#allocation2 + $0x134] ss:$8 sps:$4 sm:$0xff]   ;;  %v743_v15 = vld [vmem:[#allocation2 + $0x130] ss:$8 sps:$4 sm:$0xff]   ;;  %v744_v16 = vld [vmem:[#allocation2 + $0x44] ss:$8 sps:$4 sm:$0xff]  }
  0x18   :  { %503 = vmatpush1.bf16.msra.mxu1 %v730_v6  ;;  %v746_v17 = vld [vmem:[#allocation2 + $0x144] ss:$8 sps:$4 sm:$0xff]   ;;  %v748_v18 = vld [vmem:[#allocation2 + $0x40] ss:$8 sps:$4 sm:$0xff]   ;;  %v750_v20 = vld [vmem:[#allocation2 + $0x54] ss:$8 sps:$4 sm:$0xff]  }
  0x19   :  { %544 = vmatpush1.bf16.msra.mxu0 %v731_v7  ;;  %504 = vmatprep.subr.bf16.mxu1 %v732_v8  ;;  %v749_v19 = vld [vmem:[#allocation2 + $0x140] ss:$8 sps:$4 sm:$0xff]   ;;  %v752_v21 = vld [vmem:[#allocation2 + $0x154] ss:$8 sps:$4 sm:$0xff]   ;;  %v754_v22 = vld [vmem:[#allocation2 + $0x50] ss:$8 sps:$4 sm:$0xff]  }
  0x1a   :  { %545 = vmatprep.subr.bf16.mxu0 %v734_v9  ;;  %v755_v23 = vld [vmem:[#allocation2 + $0x150] ss:$8 sps:$4 sm:$0xff]   ;;  %v756_v24 = vld [vmem:[#allocation2 + $0x64] ss:$8 sps:$4 sm:$0xff]   ;;  %v760_v26 = vld [vmem:[#allocation2 + $0x60] ss:$8 sps:$4 sm:$0xff]  }
  0x1b   :  { %v758_v25 = vld [vmem:[#allocation2 + $0x164] ss:$8 sps:$4 sm:$0xff]   ;;  %v761_v27 = vld [vmem:[#allocation2 + $0x160] ss:$8 sps:$4 sm:$0xff]   ;;  %v762_v28 = vld [vmem:[#allocation2 + $0x74] ss:$8 sps:$4 sm:$0xff]  }
  0x1c   :  { %505 = vmatpush1.bf16.msra.mxu1 %v736_v10  ;;  %v764_v29 = vld [vmem:[#allocation2 + $0x174] ss:$8 sps:$4 sm:$0xff]   ;;  %v766_v30 = vld [vmem:[#allocation2 + $0x70] ss:$8 sps:$4 sm:$0xff]   ;;  %v768_v32 = vld [vmem:[#allocation2 + $0x84] ss:$8 sps:$4 sm:$0xff]  }
  0x1d   :  { %546 = vmatpush1.bf16.msra.mxu0 %v737_v11  ;;  %506 = vmatprep.subr.bf16.mxu1 %v738_v12  ;;  %v767_v31 = vld [vmem:[#allocation2 + $0x170] ss:$8 sps:$4 sm:$0xff]   ;;  %v770_v33 = vld [vmem:[#allocation2 + $0x184] ss:$8 sps:$4 sm:$0xff]   ;;  %v772_v34 = vld [vmem:[#allocation2 + $0x80] ss:$8 sps:$4 sm:$0xff]  }
  0x1e   :  { %547 = vmatprep.subr.bf16.mxu0 %v740_v13  ;;  %v773_v35 = vld [vmem:[#allocation2 + $0x180] ss:$8 sps:$4 sm:$0xff]   ;;  %v774_v36 = vld [vmem:[#allocation2 + $0x94] ss:$8 sps:$4 sm:$0xff]   ;;  %v778_v38 = vld [vmem:[#allocation2 + $0x90] ss:$8 sps:$4 sm:$0xff]  }
  0x1f   :  { %v776_v37 = vld [vmem:[#allocation2 + $0x194] ss:$8 sps:$4 sm:$0xff]   ;;  %v779_v39 = vld [vmem:[#allocation2 + $0x190] ss:$8 sps:$4 sm:$0xff]   ;;  %v780_v40 = vld [vmem:[#allocation2 + $0xa4] ss:$8 sps:$4 sm:$0xff]  }
  0x20   :  { %507 = vmatpush1.bf16.msra.mxu1 %v742_v14  ;;  %v782_v41 = vld [vmem:[#allocation2 + $0x1a4] ss:$8 sps:$4 sm:$0xff]   ;;  %v784_v42 = vld [vmem:[#allocation2 + $0xa0] ss:$8 sps:$4 sm:$0xff]   ;;  %v786_v44 = vld [vmem:[#allocation2 + $0xb4] ss:$8 sps:$4 sm:$0xff]  }
  0x21   :  { %548 = vmatpush1.bf16.msra.mxu0 %v743_v15  ;;  %508 = vmatprep.subr.bf16.mxu1 %v744_v16  ;;  %v785_v43 = vld [vmem:[#allocation2 + $0x1a0] ss:$8 sps:$4 sm:$0xff]   ;;  %vm33_vm0 = vcmask 1043456   ;;  %v788_v45 = vld [vmem:[#allocation2 + $0x1b4] ss:$8 sps:$4 sm:$0xff]   ;;  %vm99_vm1 = vcmask 1041409  }
  0x22   :  { %549 = vmatprep.subr.bf16.mxu0 %v746_v17  ;;  %v790_v46 = vld [vmem:[#allocation2 + $0xb0] ss:$8 sps:$4 sm:$0xff]   ;;  %v884_v47 = vld [vmem:[%s919_s0] sm:$0xff]  ;;  %v889_v49 = vld [vmem:[%s919_s0 + $0x8] sm:$0xff] }
  0x23   :  { %v791_v48 = vld [vmem:[#allocation2 + $0x1b0] ss:$8 sps:$4 sm:$0xff]   ;;  %v29_v50 = vcombine.high %v884_v47, %v884_v47  ;;  %v34_v51 = vsel %vm33_vm0, %v884_v47, 0.0  ;;  %v67_v52 = vsel %vm33_vm0, %v884_v47, -inf  ;;  %v792_v53 = vld [vmem:[#allocation2 + $0xc4] ss:$8 sps:$4 sm:$0xff]   ;;  %v30_v54 = vcombine.high %v889_v49, %v889_v49 }
  0x24   :  { %509 = vmatpush1.bf16.msra.mxu1 %v748_v18  ;;  %v35_v55 = vrot.slane %v34_v51, 4  ;;  %v48_v56 = vsel %vm33_vm0, %v889_v49, 0.0  ;;  %v68_v57 = vrot.slane %v67_v52, 4  ;;  %v794_v58 = vld [vmem:[#allocation2 + $0x1c4] ss:$8 sps:$4 sm:$0xff]   ;;  %v81_v62 = vsel %vm33_vm0, %v889_v49, -inf }
  0x25   :  { %550 = vmatpush1.bf16.msra.mxu0 %v749_v19  ;;  %510 = vmatprep.subr.bf16.mxu1 %v750_v20  ;;  %v41_v59 = vsel %vm33_vm0, %v29_v50, 0.0  ;;  %v74_v60 = vsel %vm33_vm0, %v29_v50, -inf  ;;  %v49_v61 = vrot.slane %v48_v56, 4  ;;  %v55_v0 = vsel %vm33_vm0, %v30_v54, 0.0  ;;  %v796_v7 = vld [vmem:[#allocation2 + $0xc0] ss:$8 sps:$4 sm:$0xff]  }
  0x26   :  { %551 = vmatprep.subr.bf16.mxu0 %v752_v21  ;;  %v42_v63 = vrot.slane %v41_v59, 4  ;;  %v75_v1 = vrot.slane %v74_v60, 4  ;;  %v88_v2 = vsel %vm33_vm0, %v30_v54, -inf  ;;  %v56_v3 = vrot.slane %v55_v0, 4  ;;  %v797_v8 = vld [vmem:[#allocation2 + $0x1c0] ss:$8 sps:$4 sm:$0xff]  }
  0x27   :  { %v89_v4 = vrot.slane %v88_v2, 4  ;;  %v36_v5 = vadd.f32 %v35_v55, %v34_v51  ;;  %v50_v6 = vadd.f32 %v49_v61, %v48_v56  ;;  %v69_v11 = vmax.f32 %v67_v52, %v68_v57  ;;  %v798_v13 = vld [vmem:[#allocation2 + $0xd4] ss:$8 sps:$4 sm:$0xff]   ;;  %v809_v50 = vld [vmem:[#allocation2 + $0x1e0] ss:$8 sps:$4 sm:$0xff]  }
  0x28   :  { %511 = vmatpush1.bf16.msra.mxu1 %v754_v22  ;;  %v43_v9 = vadd.f32 %v42_v63, %v41_v59  ;;  %v76_v10 = vmax.f32 %v74_v60, %v75_v1  ;;  %v82_v12 = vrot.slane %v81_v62, 4  ;;  %v800_v14 = vld [vmem:[#allocation2 + $0x1d4] ss:$8 sps:$4 sm:$0xff]   ;;  %v57_v15 = vadd.f32 %v56_v3, %v55_v0  ;;  %v814_v1 = vld [vmem:[#allocation2 + $0xf0] ss:$8 sps:$4 sm:$0xff]  }
  0x29   :  { %552 = vmatpush1.bf16.msra.mxu0 %v755_v23  ;;  %512 = vmatprep.subr.bf16.mxu1 %v756_v24  ;;  %v90_v16 = vmax.f32 %v88_v2, %v89_v4  ;;  %v37_v17 = vrot.slane %v36_v5, 2  ;;  %v51_v18 = vrot.slane %v50_v6, 2  ;;  %v70_v21 = vrot.slane %v69_v11, 2  ;;  %v810_v55 = vld [vmem:[#allocation2 + $0xf4] ss:$8 sps:$4 sm:$0xff]  }
  0x2a   :  { %553 = vmatprep.subr.bf16.mxu0 %v758_v25  ;;  %v44_v19 = vrot.slane %v43_v9, 2  ;;  %v77_v20 = vrot.slane %v76_v10, 2  ;;  %v83_v22 = vmax.f32 %v81_v62, %v82_v12  ;;  %v58_v23 = vrot.slane %v57_v15, 2  ;;  %v812_v56 = vld [vmem:[#allocation2 + $0x1f4] ss:$8 sps:$4 sm:$0xff]  }
  0x2b   :  { %v91_v24 = vrot.slane %v90_v16, 2  ;;  %v38_v25 = vadd.f32 %v37_v17, %v36_v5  ;;  %v815_v2 = vld [vmem:[#allocation2 + $0x1f0] ss:$8 sps:$4 sm:$0xff]  }
  0x2c   :  { %513 = vmatpush1.bf16.msra.mxu1 %v760_v26  ;;  %v52_v26 = vadd.f32 %v51_v18, %v50_v6 }
  0x2d   :  { %554 = vmatpush1.bf16.msra.mxu0 %v761_v27  ;;  %514 = vmatprep.subr.bf16.mxu1 %v762_v28  ;;  %v802_v27 = vld [vmem:[#allocation2 + $0xd0] ss:$8 sps:$4 sm:$0xff]  }
  0x2e   :  { %555 = vmatprep.subr.bf16.mxu0 %v764_v29  ;;  %v803_v28 = vld [vmem:[#allocation2 + $0x1d0] ss:$8 sps:$4 sm:$0xff]   ;;  %v45_v29 = vadd.f32 %v44_v19, %v43_v9 }
  0x30   :  { %515 = vmatpush1.bf16.msra.mxu1 %v766_v30  ;;  %v78_v30 = vmax.f32 %v76_v10, %v77_v20 }
  0x31   :  { %556 = vmatpush1.bf16.msra.mxu0 %v767_v31  ;;  %516 = vmatprep.subr.bf16.mxu1 %v768_v32  ;;  %v71_v31 = vmax.f32 %v69_v11, %v70_v21  ;;  %v84_v32 = vrot.slane %v83_v22, 2 }
  0x32   :  { %557 = vmatprep.subr.bf16.mxu0 %v770_v33  ;;  %v804_v33 = vld [vmem:[#allocation2 + $0xe4] ss:$8 sps:$4 sm:$0xff]  }
  0x34   :  { %517 = vmatpush1.bf16.msra.mxu1 %v772_v34  ;;  %v806_v34 = vld [vmem:[#allocation2 + $0x1e4] ss:$8 sps:$4 sm:$0xff]  }
  0x35   :  { %558 = vmatpush1.bf16.msra.mxu0 %v773_v35  ;;  %518 = vmatprep.subr.bf16.mxu1 %v774_v36  ;;  %v59_v35 = vadd.f32 %v58_v23, %v57_v15  ;;  %v92_v36 = vmax.f32 %v90_v16, %v91_v24 }
  0x36   :  { %559 = vmatprep.subr.bf16.mxu0 %v776_v37  ;;  %v39_v37 = vrot.slane %v38_v25, 1 }
  0x38   :  { %519 = vmatpush1.bf16.msra.mxu1 %v778_v38  ;;  %v53_v38 = vrot.slane %v52_v26, 1 }
  0x39   :  { %560 = vmatpush1.bf16.msra.mxu0 %v779_v39  ;;  %520 = vmatprep.subr.bf16.mxu1 %v780_v40  ;;  %v46_v39 = vrot.slane %v45_v29, 1  ;;  %v79_v40 = vrot.slane %v78_v30, 1 }
  0x3a   :  { %561 = vmatprep.subr.bf16.mxu0 %v782_v41  ;;  %v72_v41 = vrot.slane %v71_v31, 1 }
  0x3b   :  { %v47_v51 = vadd.f32 %v46_v39, %v45_v29  ;;  %v80_v52 = vmax.f32 %v78_v30, %v79_v40 }
  0x3c   :  { %521 = vmatpush1.bf16.msra.mxu1 %v784_v42  ;;  %v85_v42 = vmax.f32 %v83_v22, %v84_v32 }
  0x3d   :  { %562 = vmatpush1.bf16.msra.mxu0 %v785_v43  ;;  %522 = vmatprep.subr.bf16.mxu1 %v786_v44  ;;  %v60_v43 = vrot.slane %v59_v35, 1  ;;  %v93_v44 = vrot.slane %v92_v36, 1  ;;  %v64_v61 = vmul.f32 0.25, %v47_v51 }
  0x3e   :  { %563 = vmatprep.subr.bf16.mxu0 %v788_v45  ;;  %v40_v45 = vadd.f32 %v39_v37, %v38_v25  ;;  %v86_v54 = vrot.slane %v85_v42, 1 }
  0x3f   :  { %v61_v57 = vadd.f32 %v60_v43, %v59_v35 }
  0x40   :  { %523 = vmatpush1.bf16.msra.mxu1 %v790_v46  ;;  %v54_v46 = vadd.f32 %v53_v38, %v52_v26  ;;  %v63_v59 = vmul.f32 0.25, %v40_v45  ;;  %v87_v62 = vmax.f32 %v85_v42, %v86_v54  ;;  %v853_v26 = vmov 1966171168  }
  0x41   :  { %564 = vmatpush1.bf16.msra.mxu0 %v791_v48  ;;  %524 = vmatprep.subr.bf16.mxu1 %v792_v53  ;;  %v808_v48 = vld [vmem:[#allocation2 + $0xe0] ss:$8 sps:$4 sm:$0xff]   ;;  %v73_v53 = vmax.f32 %v71_v31, %v72_v41  ;;  %v66_v63 = vmul.f32 0.25, %v61_v57 }
  0x42   :  { %565 = vmatprep.subr.bf16.mxu0 %v794_v58  ;;  %v94_v58 = vmax.f32 %v92_v36, %v93_v44  ;;  %v65_v60 = vmul.f32 0.25, %v54_v46 }
  0x43   :  { %v108_v5 = vsel %vm99_vm1, %v87_v62, %v73_v53  ;;  %v101_v6 = vsel %vm99_vm1, %v66_v63, %v64_v61 }
  0x44   :  { %525 = vmatpush1.bf16.msra.mxu1 %v796_v7  ;;  %v109_v0 = vsel %vm99_vm1, %v94_v58, %v80_v52  ;;  %v100_v4 = vsel %vm99_vm1, %v65_v60, %v63_v59  ;;  %v113_v7 = vpack.c.bf16 %v101_v6, %v101_v6  ;;  %v114_v9 = vpack.c.bf16 %v108_v5, %v108_v5 }
  0x45   :  { %566 = vmatpush1.bf16.msra.mxu0 %v797_v8  ;;  %526 = vmatprep.subr.bf16.mxu1 %v798_v13  ;;  %v115_v3 = vpack.c.bf16 %v109_v0, %v109_v0  ;;  %v112_v8 = vpack.c.bf16 %v100_v4, %v100_v4 }
  0x46   :  { %567 = vmatprep.subr.bf16.mxu0 %v800_v14  ;;  %532 = vmatprep.mubr.bf16.mxu1 %v113_v7 }
  0x47   :  { %573 = vmatprep.mubr.bf16.mxu0 %v115_v3 }
  0x48   :  { %527 = vmatpush1.bf16.msra.mxu1 %v802_v27  ;;  %v598_v27 = vunpack.c.l.s4 %v853_v26 }
  0x49   :  { %568 = vmatpush1.bf16.msra.mxu0 %v803_v28  ;;  %528 = vmatprep.subr.bf16.mxu1 %v804_v33  ;;  %v600_v28 = vlaneseq }
  0x4a   :  { %569 = vmatprep.subr.bf16.mxu0 %v806_v34  ;;  %v599_v29 = vunpack.c.0.s8 %v598_v27 }
  0x4b   :  { %v601_v30 = vshrl.u32 %v600_v28, 7 }
  0x4c   :  { %529 = vmatpush1.bf16.msra.mxu1 %v808_v48 }
  0x4d   :  { %570 = vmatpush1.bf16.msra.mxu0 %v809_v50  ;;  %530 = vmatprep.subr.bf16.mxu1 %v810_v55  ;;  %v602_v32 = vsub.s32 %v599_v29, %v601_v30  ;;  %v621_v36 = vsub.s32 0, %v601_v30  ;;  %v625_v37 = vsub.s32 1, %v601_v30 }
  0x4e   :  { %571 = vmatprep.subr.bf16.mxu0 %v812_v56 }
  0x50   :  { %531 = vmatpush1.bf16.msra.mxu1 %v814_v1 }
  0x51   :  { %572 = vmatpush1.bf16.msra.mxu0 %v815_v2 }
  0x53   :  { %533 = vmatmul.mubr.bf16.vlgmr.msra.gmra.mrb[0].mxu1 %v112_v8 }
  0x54   :  { %574 = vmatmul.mubr.bf16.vlgmr.msra.gmra.mrb[0].mxu0 %v114_v9 }
 0x126   :  { %v534_v10 = vpop.f32.mrb[0].mxu1 }
 0x127   :  { %v575_v11 = vpop.f32.mrb[0].mxu0  ;;  %v536_v13 = vpop.f32.mrb[1].mxu1 }
 0x128   :  { %v576_v12 = vadd.f32 %v575_v11, %v534_v10  ;;  %v577_v14 = vpop.f32.mrb[1].mxu0  ;;  %v538_v16 = vpop.f32.mrb[2].mxu1 }
 0x129   :  { %v578_v15 = vadd.f32 %v577_v14, %v536_v13  ;;  %v579_v17 = vpop.f32.mrb[2].mxu0  ;;  %v539_v19 = vpop.f32.mrb[3].mxu1 }
 0x12a   :  { %v712_v18 = vmul.f32 -1.442695, %v576_v12  ;;  %v580_v20 = vpop.f32.mrb[3].mxu0 }
 0x12b   :  { %v713_v21 = vmul.f32 -1.442695, %v578_v15 }
 0x12c   :  { %818 = vpow2.f32 %v712_v18 }
 0x12d   :  { %820 = vpow2.f32 %v713_v21 }
 0x136   :  { %v819_v22 = vpop.eup %818 }
 0x137   :  { %v821_v23 = vpop.eup %820  ;;  %v588_v24 = vadd.f32 1.0, %v819_v22 }
 0x138   :  { %v589_v25 = vadd.f32 1.0, %v821_v23 }
 0x139   :  { %822 = vrcp.f32 %v588_v24 }
 0x13a   :  { %824 = vrcp.f32 %v589_v25 }
 0x143   :  { %v823_v31 = vpop.eup %822 }
 0x144   :  { %v825_v33 = vpop.eup %824 }
 0x145   :  { %v596_v34 = vcombine.low %v823_v31, %v825_v33 }
 0x147   :  { %v603_v35 = vrot.slane %v596_v34, %v602_v32 }
 0x149   :  { %v604_v38 = vcombine.high %v603_v35, %v603_v35  ;;  %v611_v39 = vrot.slane %v603_v35, %v602_v32 }
 0x14b   :  { %v618_v40 = vrot.slane %v604_v38, %v602_v32  ;;  %v622_v41 = vrot.slane %v611_v39, %v621_v36  ;;  %v626_v42 = vrot.slane %v611_v39, %v625_v37 }
 0x14d   :  { %v630_v43 = vrot.slane %v618_v40, %v621_v36  ;;  %v634_v44 = vrot.slane %v618_v40, %v625_v37  ;;  %v635_v45 = vcombine.low %v622_v41, %v626_v42 }
 0x14f   :  { %v636_v46 = vcombine.low %v630_v43, %v634_v44  ;;  %v639_v48 = vmul.f32 %v635_v45, %v884_v47 }
 0x151   :  { %v640_v50 = vmul.f32 %v636_v46, %v889_v49  ;;  %641 = vst [vmem:[%s921_s2] sm:$0xff] %v639_v48 }
 0x153   :  { %642 = vst [vmem:[%s921_s2 + $0x8] sm:$0xff] %v640_v50 }
 0x154   :  { %647 = vsyncpa [#allocation3], 1 }

</bundles_post_ra>
